<compile_context>
chip_gen: v5e
topology: v5e:2x2
jax: 0.10.0
libtpu: 0.0.40
codegen_flags: <defaults>
</compile_context>

<pallas_src>
import jax
import jax.numpy as jnp
from jax.experimental import pallas as pl
from jax.experimental.pallas import tpu as pltpu

# Relations ordered so relations sharing a destination type are consecutive
# (required by the in-kernel hetero-sum accumulation; asserted below).
REL_NAMES = ['DDI', 'DPI', 'PPI']
REL_TYPES = {
    'DDI': ('drug', 'drug'),
    'DPI': ('drug', 'protein'),
    'PPI': ('protein', 'protein'),
}
NTYPES = ['drug', 'protein']
NTYPE_ID = {t: i for i, t in enumerate(NTYPES)}

MAX_TM = 256   # dst-row tile cap (v6e/v7x MXU is 256x256; fine on v5e too)
MAX_TK = 512   # source-chunk tile (k axis)


def _round_up(x, m):
    return ((x + m - 1) // m) * m


# ----------------------------------------------------------------------------
# Fused kernel: one (dst-row tile m, relation r, source chunk k) grid step of
# a HeteroGraphConv layer.  For each relation r:
#     y = (A_r @ XW_r) / deg_r + b_r          (deg summed over all k chunks)
# and y is summed into the output slab of the relation's destination type.
# ----------------------------------------------------------------------------
def _hetero_layer_kernel(dst_ref, first_ref,            # scalar prefetch (SMEM)
                         a_ref, xw_ref, b_ref, o_ref,   # tensor blocks (VMEM)
                         acc_ref, deg_ref):             # scratch (VMEM)
    # a_ref  : (1, TM, TK)  bf16  raw 0/1 adjacency tile (dst rows x src chunk)
    # xw_ref : (1, TK, FO)  bf16  precomputed X @ W chunk for this relation
    # b_ref  : (1, 1,  FO)  f32   relation bias
    # o_ref  : (1, TM, FO)  f32   output tile of this relation's dst ntype
    # acc_ref: (TM, FO) f32, deg_ref: (TM, 1) f32
    r = pl.program_id(1)
    k = pl.program_id(2)
    nk = pl.num_programs(2)

    @pl.when(k == 0)
    def _():
        acc_ref[...] = jnp.zeros_like(acc_ref)
        deg_ref[...] = jnp.zeros_like(deg_ref)

    a = a_ref[0]                                                        # bf16 [TM, TK]
    # bf16 x bf16 on the MXU, f32 accumulation in VMEM scratch.
    acc_ref[...] += jnp.dot(a, xw_ref[0], preferred_element_type=jnp.float32)
    # norm='right' in-degree, accumulated across ALL k chunks before clamping.
    deg_ref[...] += jnp.sum(a.astype(jnp.float32), axis=1, keepdims=True)

    @pl.when(k == nk - 1)
    def _finalize():
        inv = pl.reciprocal(jnp.maximum(deg_ref[...], 1.0), approx=True)  # EUP
        y = acc_ref[...] * inv + b_ref[0]

        first = first_ref[r]

        @pl.when(first == 1)      # first relation writing this dst-type slab
        def _():
            o_ref[0] = y

        @pl.when(first == 0)      # hetero 'sum' aggregation, in resident VMEM
        def _():
            o_ref[0] = o_ref[0] + y


def _fit_rows(x, rows):
    """Slice or zero-pad the leading axis to `rows` (extra rows are harmless:
    they correspond to zero adjacency columns)."""
    if x.shape[0] >= rows:
        return x[:rows]
    return jnp.pad(x, ((0, rows - x.shape[0]), (0, 0)))


# ----------------------------------------------------------------------------
# One dglnn.HeteroGraphConv layer (GraphConv norm='right', aggregate='sum'),
# all relations fused into a single pallas_call.
# ----------------------------------------------------------------------------
def hetero_graph_conv_fused(block_adj, feats, layer_params):
    """block_adj: dict rel -> dense 0/1 adjacency [n_dst(dst_t), n_src(src_t)]
    feats:      dict ntype -> [>= n_src(ntype), >= f_in] (may be row/lane padded)
    layer_params: dict rel -> {'w': [f_in, f_out], 'b': [f_out]}
    Returns (dict dst_ntype -> padded [nd_pad, fo_pad] f32, n_dst dict, f_out).
    """
    n_rel = len(REL_NAMES)
    n_typ = len(NTYPES)

    # Relations sharing a destination type MUST be consecutive in REL_NAMES so
    # the output VMEM block stays resident between accumulating grid steps.
    dst_seq = [REL_TYPES[r][1] for r in REL_NAMES]
    for t in set(dst_seq):
        idx = [i for i, d in enumerate(dst_seq) if d == t]
        assert idx == list(range(idx[0], idx[0] + len(idx))), (
            "relations sharing a dst type must be consecutive in REL_NAMES")

    f_in, f_out = layer_params[REL_NAMES[0]]['w'].shape
    fo_pad = _round_up(f_out, 128)                 # lane-dense output stores

    n_src, n_dst = {}, {}
    for rel in REL_NAMES:
        src_t, dst_t = REL_TYPES[rel]
        nd, ns = block_adj[rel].shape
        n_dst[dst_t] = max(n_dst.get(dst_t, 0), nd)
        n_src[src_t] = max(n_src.get(src_t, 0), ns)
    max_nd = max(n_dst.values())
    max_ns = max(n_src.values())

    # ---- tile sizes ----------------------------------------------------
    tm = min(MAX_TM, _round_up(max_nd, 8))         # dst-row tile ("parallel")
    nd_pad = _round_up(max_nd, tm)
    num_m = nd_pad // tm

    ns8 = _round_up(max_ns, 8)
    if ns8 <= MAX_TK:
        tk, ns_pad = ns8, ns8                      # single k chunk (full dim)
    else:
        tk = MAX_TK                                # k tiling (multiple of 128)
        ns_pad = _round_up(max_ns, tk)
    num_k = ns_pad // tk

    # ---- stacked, padded operands (zero padding keeps semantics exact) --
    a_list, xw_list, b_list = [], [], []
    dst_idx, is_first = [], []
    seen_dst = set()
    for rel in REL_NAMES:
        src_t, dst_t = REL_TYPES[rel]
        a = block_adj[rel]
        a_list.append(jnp.pad(a.astype(jnp.bfloat16),
                              ((0, nd_pad - a.shape[0]), (0, ns_pad - a.shape[1]))))
        # Hoisted X @ W: per-relation, once, in the wrapper (XLA fuses slices).
        x = _fit_rows(feats[src_t].astype(jnp.float32), ns_pad)
        xw = jnp.dot(x[:, :f_in], layer_params[rel]['w'],
                     preferred_element_type=jnp.float32)
        xw_list.append(jnp.pad(xw, ((0, 0), (0, fo_pad - f_out))).astype(jnp.bfloat16))
        b_list.append(jnp.pad(layer_params[rel]['b'].astype(jnp.float32),
                              (0, fo_pad - f_out))[None, :])
        dst_idx.append(NTYPE_ID[dst_t])
        is_first.append(1 if dst_t not in seen_dst else 0)
        seen_dst.add(dst_t)

    a_stack = jnp.stack(a_list)                    # (n_rel, nd_pad, ns_pad) bf16
    xw_stack = jnp.stack(xw_list)                  # (n_rel, ns_pad, fo_pad) bf16
    b_stack = jnp.stack(b_list)                    # (n_rel, 1,      fo_pad) f32
    dst_idx = jnp.asarray(dst_idx, jnp.int32)
    is_first = jnp.asarray(is_first, jnp.int32)

    # ---- VMEM budget (double-buffered inputs/outputs + scratch) ---------
    tile_bytes = (2 * (tm * tk * 2 + tk * fo_pad * 2 + fo_pad * 4)   # inputs x2
                  + 2 * tm * fo_pad * 4                              # output x2
                  + tm * fo_pad * 4 + tm * 4)                        # acc + deg
    vmem_limit = int(min(48 * 1024 * 1024, max(16 * 1024 * 1024, 2 * tile_bytes)))

    cost = pl.CostEstimate(
        flops=2 * n_rel * nd_pad * ns_pad * fo_pad,
        transcendentals=n_rel * nd_pad,
        bytes_accessed=int(a_stack.size * 2 + num_m * xw_stack.size * 2
                           + num_m * b_stack.size * 4
                           + n_typ * nd_pad * fo_pad * 4),
    )

    out = pl.pallas_call(
        _hetero_layer_kernel,
        out_shape=jax.ShapeDtypeStruct((n_typ, nd_pad, fo_pad), jnp.float32),
        grid_spec=pltpu.PrefetchScalarGridSpec(
            num_scalar_prefetch=2,
            grid=(num_m, n_rel, num_k),    # relation + k innermost (accumulation)
            in_specs=[
                pl.BlockSpec((1, tm, tk),     lambda m, r, k, d, f: (r, m, k)),
                pl.BlockSpec((1, tk, fo_pad), lambda m, r, k, d, f: (r, k, 0)),
                pl.BlockSpec((1, 1, fo_pad),  lambda m, r, k, d, f: (r, 0, 0)),
            ],
            out_specs=pl.BlockSpec((1, tm, fo_pad),
                                   lambda m, r, k, d, f: (d[r], m, 0)),
            scratch_shapes=[pltpu.VMEM((tm, fo_pad), jnp.float32),
                            pltpu.VMEM((tm, 1), jnp.float32)],
        ),
        compiler_params=pltpu.CompilerParams(
            dimension_semantics=("parallel", "arbitrary", "arbitrary"),
            vmem_limit_bytes=vmem_limit),
        cost_estimate=cost,
    )(dst_idx, is_first, a_stack, xw_stack, b_stack)

    # Keep the padded layout between layers (padded rows carry bias values but
    # always hit zero adjacency columns in the next layer, so this is exact).
    out_padded = {t: out[NTYPE_ID[t]] for t in n_dst}
    return out_padded, n_dst, f_out


def stochastic_two_layer_rgcn(blocks, x, params):
    """blocks: [block0_adj_dict, block1_adj_dict]; x: dict ntype -> feats."""
    h, _, _ = hetero_graph_conv_fused(blocks[0], x, params['conv1'])
    h, n_dst, f_out = hetero_graph_conv_fused(blocks[1], h, params['conv2'])
    # Only the final output is sliced back to logical shapes.
    return {t: h[t][:n_dst[t], :f_out] for t in h}


# ----------------------------------------------------------------------------
# Pure-JAX reference (unpadded, unfused) for a correctness check.
# ----------------------------------------------------------------------------
def _hetero_layer_reference(block_adj, feats, layer_params):
    outs = {}
    for rel in REL_NAMES:
        src_t, dst_t = REL_TYPES[rel]
        a = block_adj[rel].astype(jnp.float32)
        deg = jnp.maximum(a.sum(axis=1, keepdims=True), 1.0)
        y = ((a / deg) @ feats[src_t]) @ layer_params[rel]['w'] + layer_params[rel]['b']
        outs[dst_t] = y if dst_t not in outs else outs[dst_t] + y
    return outs


def stochastic_two_layer_rgcn_reference(blocks, x, params):
    h = _hetero_layer_reference(blocks[0], x, params['conv1'])
    return _hetero_layer_reference(blocks[1], h, params['conv2'])


# ----------------------------------------------------------------------------
# Deterministic parameter / input construction.
# ----------------------------------------------------------------------------
def init_params(key, in_feat, hidden_feat, out_feat):
    params = {'conv1': {}, 'conv2': {}}
    for layer, (fi, fo) in (('conv1', (in_feat, hidden_feat)),
                            ('conv2', (hidden_feat, out_feat))):
        for rel in REL_NAMES:
            key, kw = jax.random.split(key)
            limit = (6.0 / (fi + fo)) ** 0.5      # xavier-uniform-like; bias zeros (DGL)
            w = jax.random.uniform(kw, (fi, fo), jnp.float32, -limit, limit)
            params[layer][rel] = {'w': w, 'b': jnp.zeros((fo,), jnp.float32)}
    return params


def make_block(key, n_dst, n_src_drug, n_src_prot, p=0.4):
    """Dense 0/1 adjacency per relation for one sampled bipartite block."""
    k1, k2, k3 = jax.random.split(key, 3)
    nd_drug, nd_prot = n_dst
    return {
        'DDI': jax.random.bernoulli(k1, p, (nd_drug, n_src_drug)).astype(jnp.float32),
        'DPI': jax.random.bernoulli(k2, p, (nd_prot, n_src_drug)).astype(jnp.float32),
        'PPI': jax.random.bernoulli(k3, p, (nd_prot, n_src_prot)).astype(jnp.float32),
    }


if __name__ == "__main__":
    key = jax.random.PRNGKey(0)

    in_feat, hidden_feat, out_feat = 16, 32, 8

    # Node counts across the two sampled blocks (small, synthetic).
    n_src_drug, n_src_prot = 12, 10          # layer-0 input frontier
    n_mid_drug, n_mid_prot = 8, 8            # block0 destinations / block1 sources
    n_out_drug, n_out_prot = 4, 4            # block1 destinations (final output)

    key, kx1, kx2, kb0, kb1, kp = jax.random.split(key, 6)
    x = {
        'drug': jax.random.normal(kx1, (n_src_drug, in_feat), jnp.float32),
        'protein': jax.random.normal(kx2, (n_src_prot, in_feat), jnp.float32),
    }
    blocks = [
        make_block(kb0, (n_mid_drug, n_mid_prot), n_src_drug, n_src_prot),
        make_block(kb1, (n_out_drug, n_out_prot), n_mid_drug, n_mid_prot),
    ]
    params = init_params(kp, in_feat, hidden_feat, out_feat)

    out = stochastic_two_layer_rgcn(blocks, x, params)
    out = jax.tree_util.tree_map(jax.block_until_ready, out)

    assert out['drug'].shape == (n_out_drug, out_feat)
    assert out['protein'].shape == (n_out_prot, out_feat)
    assert out['drug'].dtype == jnp.float32

    ref = stochastic_two_layer_rgcn_reference(blocks, x, params)
    for t in NTYPES:
        err = float(jnp.max(jnp.abs(out[t] - ref[t])))
        assert err < 5e-2, f"mismatch for {t}: max abs err = {err}"

    print("KERNEL_OK")
</pallas_src>

<mosaic_0001>
module attributes {stable_mosaic.version = 11 : i64} {
  func.func @_hetero_layer_kernel(%arg0: i32, %arg1: i32, %arg2: i32, %arg3: memref<3xi32, #tpu.memory_space<smem>>, %arg4: memref<3xi32, #tpu.memory_space<smem>>, %arg5: memref<1x8x16xbf16, #tpu.memory_space<vmem>>, %arg6: memref<1x16x128xbf16, #tpu.memory_space<vmem>>, %arg7: memref<1x1x128xf32, #tpu.memory_space<vmem>>, %arg8: memref<1x8x128xf32, #tpu.memory_space<vmem>>, %arg9: memref<8x128xf32, #tpu.memory_space<vmem>>, %arg10: memref<8x1xf32, #tpu.memory_space<vmem>>) attributes {dimension_semantics = [#tpu.dimension_semantics<parallel>, #tpu.dimension_semantics<arbitrary>, #tpu.dimension_semantics<arbitrary>], iteration_bounds = array<i64: 1, 3, 1>, scalar_prefetch = 2 : i64, scratch_operands = 2 : i64, tpu.core_type = #tpu.core_type<tc>, window_params = [{transform_indices = @transform_0, window_bounds = array<i64: 1, 8, 16>}, {transform_indices = @transform_1, window_bounds = array<i64: 1, 16, 128>}, {transform_indices = @transform_2, window_bounds = array<i64: 1, 1, 128>}, {transform_indices = @transform_3, window_bounds = array<i64: 1, 8, 128>}]} {
    %c0_i32 = arith.constant 0 : i32
    %0 = arith.cmpi eq, %arg2, %c0_i32 : i32
    %1 = arith.extui %0 : i1 to i32
    %c0_i32_0 = arith.constant 0 : i32
    %2 = arith.cmpi ne, %1, %c0_i32_0 : i32
    scf.if %2 {
      %cst_17 = arith.constant 0.000000e+00 : f32
      %20 = vector.broadcast %cst_17 : f32 to vector<8x128xf32>
      %c0_18 = arith.constant 0 : index
      %c0_19 = arith.constant 0 : index
      %21 = vector.load %arg9[%c0_18, %c0_19] : memref<8x128xf32, #tpu.memory_space<vmem>>, vector<8x128xf32>
      tpu.vector_store %arg9[%c0_18, %c0_19], %20 {strides = array<i32>} : memref<8x128xf32, #tpu.memory_space<vmem>>, vector<8x128xf32>,
      %cst_20 = arith.constant 0.000000e+00 : f32
      %22 = vector.broadcast %cst_20 : f32 to vector<8x1xf32>
      %c0_21 = arith.constant 0 : index
      %c0_22 = arith.constant 0 : index
      %23 = vector.load %arg10[%c0_21, %c0_22] : memref<8x1xf32, #tpu.memory_space<vmem>>, vector<8x1xf32>
      tpu.vector_store %arg10[%c0_21, %c0_22], %22 {strides = array<i32>} : memref<8x1xf32, #tpu.memory_space<vmem>>, vector<8x1xf32>,
    } else {
    }
    %c0 = arith.constant 0 : index
    %c0_1 = arith.constant 0 : index
    %c0_2 = arith.constant 0 : index
    %3 = vector.load %arg5[%c0, %c0_1, %c0_2] : memref<1x8x16xbf16, #tpu.memory_space<vmem>>, vector<1x8x16xbf16>
    %4 = vector.shape_cast %3 : vector<1x8x16xbf16> to vector<8x16xbf16>
    %c0_3 = arith.constant 0 : index
    %c0_4 = arith.constant 0 : index
    %5 = vector.load %arg9[%c0_3, %c0_4] : memref<8x128xf32, #tpu.memory_space<vmem>>, vector<8x128xf32>
    %c0_5 = arith.constant 0 : index
    %c0_6 = arith.constant 0 : index
    %c0_7 = arith.constant 0 : index
    %6 = vector.load %arg6[%c0_5, %c0_6, %c0_7] : memref<1x16x128xbf16, #tpu.memory_space<vmem>>, vector<1x16x128xbf16>
    %7 = vector.shape_cast %6 : vector<1x16x128xbf16> to vector<16x128xbf16>
    %cst = arith.constant dense<0.000000e+00> : vector<8x128xf32>
    %8 = tpu.matmul %4, %7, %cst {dimension_numbers = #tpu.dot_dimension_numbers<[1], [0], [0], [1], [0, 0, 1, 1], [], []>} : vector<8x16xbf16>, vector<16x128xbf16>, vector<8x128xf32> -> vector<8x128xf32>
    %9 = arith.addf %5, %8 : vector<8x128xf32>
    %c0_8 = arith.constant 0 : index
    %c0_9 = arith.constant 0 : index
    %10 = vector.load %arg9[%c0_8, %c0_9] : memref<8x128xf32, #tpu.memory_space<vmem>>, vector<8x128xf32>
    tpu.vector_store %arg9[%c0_8, %c0_9], %9 {strides = array<i32>} : memref<8x128xf32, #tpu.memory_space<vmem>>, vector<8x128xf32>,
    %c0_10 = arith.constant 0 : index
    %c0_11 = arith.constant 0 : index
    %11 = vector.load %arg10[%c0_10, %c0_11] : memref<8x1xf32, #tpu.memory_space<vmem>>, vector<8x1xf32>
    %12 = arith.extf %4 : vector<8x16xbf16> to vector<8x16xf32>
    %cst_12 = arith.constant dense<0.000000e+00> : vector<8xf32>
    %13 = vector.multi_reduction <add>, %12, %cst_12 [1] : vector<8x16xf32> to vector<8xf32>
    %14 = vector.shape_cast %13 : vector<8xf32> to vector<8x1xf32>
    %15 = arith.addf %11, %14 : vector<8x1xf32>
    %c0_13 = arith.constant 0 : index
    %c0_14 = arith.constant 0 : index
    %16 = vector.load %arg10[%c0_13, %c0_14] : memref<8x1xf32, #tpu.memory_space<vmem>>, vector<8x1xf32>
    tpu.vector_store %arg10[%c0_13, %c0_14], %15 {strides = array<i32>} : memref<8x1xf32, #tpu.memory_space<vmem>>, vector<8x1xf32>,
    %c0_i32_15 = arith.constant 0 : i32
    %17 = arith.cmpi eq, %arg2, %c0_i32_15 : i32
    %18 = arith.extui %17 : i1 to i32
    %c0_i32_16 = arith.constant 0 : i32
    %19 = arith.cmpi ne, %18, %c0_i32_16 : i32
    scf.if %19 {
      %c0_17 = arith.constant 0 : index
      %c0_18 = arith.constant 0 : index
      %20 = vector.load %arg10[%c0_17, %c0_18] : memref<8x1xf32, #tpu.memory_space<vmem>>, vector<8x1xf32>
      %cst_19 = arith.constant 1.000000e+00 : f32
      %21 = vector.broadcast %cst_19 : f32 to vector<8x1xf32>
      %22 = arith.maximumf %20, %21 : vector<8x1xf32>
      %23 = tpu.reciprocal %22 {approx = true} : vector<8x1xf32> -> vector<8x1xf32>
      %c0_20 = arith.constant 0 : index
      %c0_21 = arith.constant 0 : index
      %24 = vector.load %arg9[%c0_20, %c0_21] : memref<8x128xf32, #tpu.memory_space<vmem>>, vector<8x128xf32>
      %25 = vector.broadcast %23 : vector<8x1xf32> to vector<8x128xf32>
      %26 = arith.mulf %24, %25 : vector<8x128xf32>
      %c0_22 = arith.constant 0 : index
      %c0_23 = arith.constant 0 : index
      %c0_24 = arith.constant 0 : index
      %27 = vector.load %arg7[%c0_22, %c0_23, %c0_24] : memref<1x1x128xf32, #tpu.memory_space<vmem>>, vector<1x1x128xf32>
      %28 = vector.shape_cast %27 : vector<1x1x128xf32> to vector<1x128xf32>
      %29 = vector.broadcast %28 : vector<1x128xf32> to vector<8x128xf32>
      %30 = arith.addf %26, %29 : vector<8x128xf32>
      %31 = arith.index_cast %arg1 : i32 to index
      %32 = memref.load %arg4[%31] : memref<3xi32, #tpu.memory_space<smem>>
      %c1_i32 = arith.constant 1 : i32
      %33 = arith.cmpi eq, %32, %c1_i32 : i32
      %34 = arith.extui %33 : i1 to i32
      %c0_i32_25 = arith.constant 0 : i32
      %35 = arith.cmpi ne, %34, %c0_i32_25 : i32
      scf.if %35 {
        %c0_28 = arith.constant 0 : index
        %c0_29 = arith.constant 0 : index
        %c0_30 = arith.constant 0 : index
        %39 = vector.load %arg8[%c0_28, %c0_29, %c0_30] : memref<1x8x128xf32, #tpu.memory_space<vmem>>, vector<1x8x128xf32>
        %40 = vector.shape_cast %39 : vector<1x8x128xf32> to vector<8x128xf32>
        %41 = vector.shape_cast %30 : vector<8x128xf32> to vector<1x8x128xf32>
        tpu.vector_store %arg8[%c0_28, %c0_29, %c0_30], %41 {strides = array<i32>} : memref<1x8x128xf32, #tpu.memory_space<vmem>>, vector<1x8x128xf32>,
      } else {
      }
      %c0_i32_26 = arith.constant 0 : i32
      %36 = arith.cmpi eq, %32, %c0_i32_26 : i32
      %37 = arith.extui %36 : i1 to i32
      %c0_i32_27 = arith.constant 0 : i32
      %38 = arith.cmpi ne, %37, %c0_i32_27 : i32
      scf.if %38 {
        %c0_28 = arith.constant 0 : index
        %c0_29 = arith.constant 0 : index
        %c0_30 = arith.constant 0 : index
        %39 = vector.load %arg8[%c0_28, %c0_29, %c0_30] : memref<1x8x128xf32, #tpu.memory_space<vmem>>, vector<1x8x128xf32>
        %40 = vector.shape_cast %39 : vector<1x8x128xf32> to vector<8x128xf32>
        %41 = arith.addf %40, %30 : vector<8x128xf32>
        %c0_31 = arith.constant 0 : index
        %c0_32 = arith.constant 0 : index
        %c0_33 = arith.constant 0 : index
        %42 = vector.load %arg8[%c0_31, %c0_32, %c0_33] : memref<1x8x128xf32, #tpu.memory_space<vmem>>, vector<1x8x128xf32>
        %43 = vector.shape_cast %42 : vector<1x8x128xf32> to vector<8x128xf32>
        %44 = vector.shape_cast %41 : vector<8x128xf32> to vector<1x8x128xf32>
        tpu.vector_store %arg8[%c0_31, %c0_32, %c0_33], %44 {strides = array<i32>} : memref<1x8x128xf32, #tpu.memory_space<vmem>>, vector<1x8x128xf32>,
      } else {
      }
    } else {
    }
    return
  }
  func.func @transform_0(%arg0: i32, %arg1: i32, %arg2: i32, %arg3: memref<3xi32, #tpu.memory_space<smem>>, %arg4: memref<3xi32, #tpu.memory_space<smem>>) -> (i32, i32, i32) {
    %c0_i32 = arith.constant 0 : i32
    return %arg1, %arg0, %arg2 : i32, i32, i32
  }
  func.func @transform_1(%arg0: i32, %arg1: i32, %arg2: i32, %arg3: memref<3xi32, #tpu.memory_space<smem>>, %arg4: memref<3xi32, #tpu.memory_space<smem>>) -> (i32, i32, i32) {
    %c0_i32 = arith.constant 0 : i32
    %c0_i32_0 = arith.constant 0 : i32
    return %arg1, %arg2, %c0_i32 : i32, i32, i32
  }
  func.func @transform_2(%arg0: i32, %arg1: i32, %arg2: i32, %arg3: memref<3xi32, #tpu.memory_space<smem>>, %arg4: memref<3xi32, #tpu.memory_space<smem>>) -> (i32, i32, i32) {
    %c0_i32 = arith.constant 0 : i32
    %c0_i32_0 = arith.constant 0 : i32
    %c0_i32_1 = arith.constant 0 : i32
    return %arg1, %c0_i32, %c0_i32_0 : i32, i32, i32
  }
  func.func @transform_3(%arg0: i32, %arg1: i32, %arg2: i32, %arg3: memref<3xi32, #tpu.memory_space<smem>>, %arg4: memref<3xi32, #tpu.memory_space<smem>>) -> (i32, i32, i32) {
    %0 = arith.index_cast %arg1 : i32 to index
    %1 = memref.load %arg3[%0] : memref<3xi32, #tpu.memory_space<smem>>
    %c0_i32 = arith.constant 0 : i32
    %c0_i32_0 = arith.constant 0 : i32
    return %1, %arg0, %c0_i32 : i32, i32, i32
  }
}

</mosaic_0001>

<bundles_post_ra>
// kernel: tpu_custom_call.1
= control target key start
LH: loop header
LB: loop body
LE: loop exit
PB: predicated region body
PF: predicated region fallthrough
CT: control target
= control target key end

     0   :  { %s834_s24 = smov [#allocation5]   ;;  %s835_s25 = smov [#allocation6]   ;;  %s1068_s0 = inlined_call_operand.hbm [shape: s32[3], index: 0, kind: input, shape index: {}]   ;;  %s1069_s2 = inlined_call_operand.hbm [shape: bf16[3,8,16], index: 2, kind: input, shape index: {}]   ;;  %s1070_s3 = inlined_call_operand.hbm [shape: bf16[3,16,128], index: 3, kind: input, shape index: {}]   ;;  %s1071_s4 = inlined_call_operand.vmem [shape: f32[3,1,128], index: 4, kind: input, shape index: {}]   ;;  %s1072_s5 = inlined_call_operand.hbm [shape: f32[2,8,128], index: 5, kind: output, shape index: {}]   ;;  %s1073_s1 = inlined_call_operand.hbm [shape: s32[3], index: 1, kind: input, shape index: {}]  }
   0x1   :  { %1075 = sst [smem:[#allocation20_spill]] %s1069_s2  ;;  %s11_s20 = sshll.u32 %s1068_s0, 4  ;;  %s12_s20 = int_to_ptr.hbm [resolvable:$true] %s11_s20 }
   0x2   :  { %s16_s23 = sshll.u32 %s1073_s1, 4  ;;  %s17_s23 = int_to_ptr.hbm [resolvable:$true] %s16_s23 }
   0x3   :  { %14 = dma.hbm_to_smem %s12_s20, 16, %s834_s24, [#allocation4] }
   0x4   :  { %19 = dma.hbm_to_smem %s17_s23, 16, %s835_s25, [#allocation4] }
   0x5   :  { %784 = dma.done.wait [#allocation4], 32 }
   0x6   :  { %785 = vsyncadd [#allocation4], 4294967264 }
   0x7   :  { %22 = sfence }
   0x8   :  { %23 = vsyncpa [#allocation8], 0 }
   0x9   :  { %25 = vsyncpa [#allocation8 + $0x1], 0 }
   0xa   :  { %26 = vsyncpa [#allocation11], 0 }
   0xb   :  { %28 = vsyncpa [#allocation11 + $0x1], 0 }
   0xc   :  { %29 = vsyncpa [#allocation9], 0 }
   0xd   :  { %31 = vsyncpa [#allocation9 + $0x1], 0  ;;  %s876_s0 = smov 0   ;;  %s878_s26 = smov 0  }
   0xe   :  { %s880_s1 = smov 0   ;;  %s882_s27 = smov 0  }
   0xf   :  { %s884_s28 = smov 0   ;;  %s886_s29 = smov 0  }
  0x10   :  { %s888_s30 = smov 0   ;;  %s890_s6 = smov 0  }
  0x11   :  { %s892_s7 = smov 0  }
  0x12 LB: > { %s507_s8 = sadd.s32 4294967295, %s832_s7   ;;  %s508_s9 = sadd.s32 4294967294, %s832_s7   ;;  %s832_s7 = sphi %s892_s7, %s37_s7   ;;  %s828_s6 = sphi %s890_s6, %s1093_s6   ;;  %s824_s30 = sphi %s888_s30, %s1092_s30   ;;  %s820_s29 = sphi %s886_s29, %s1091_s29   ;;  %s816_s28 = sphi %s884_s28, %s1090_s28   ;;  %s812_s27 = sphi %s882_s27, %s1089_s27   ;;  %s808_s1 = sphi %s880_s1, %s1088_s1   ;;  %s804_s26 = sphi %s878_s26, %s1087_s26   ;;  %s800_s0 = sphi %s876_s0, %s1086_s0  }
  0x13   : > { %s52_s10 = sadd.s32 1, %s828_s6  ;;  %s67_s11 = sadd.s32 1, %s820_s29 }
  0x14   : > { %p54_p0 = scmp.ge.s32.totalorder %s52_s10, 3  ;;  %p74_p1 = scmp.ne.s32.totalorder %s820_s29, %s816_s28 }
  0x15   : > { %p75_p2 = scmp.eq.s32.totalorder %s832_s7, 0  ;;  %p80_p3 = scmp.ne.s32.totalorder %s816_s28, %s812_s27 }
  0x16   : > { %s1095_s10 = smov (%p54_p0, %s52_s10), 0  ;;  %p81_p5 = scmp.eq.s32.totalorder %s507_s8, 0 }
  0x17   : > { %1076 = sst [smem:[#allocation18_spill]] %s1095_s10  ;;  %p929_p4 = por %p75_p2, %p74_p1 }
  0x18   : > { %s60_s13 = ssub.s32 %s828_s6, %s1095_s10  ;;  %s144_s14 = sld [smem:[#allocation5 + %s828_s6]] }
  0x19   : > { %p65_p6 = scmp.eq.s32.totalorder %s60_s13, 0  ;;  %p936_p7 = por %p81_p5, %p80_p3 }
  0x1a   : > { %s145_s16 = sld [smem:[#allocation5 + %s1095_s10]]  ;;  %s151_s17 = sadd.s32 1, %s808_s1 }
  0x1b   : > { %s943_s18 = scalar_select %p65_p6, %s820_s29, %s67_s11  }
  0x1c   : > { %p161_p8 = scmp.ne.s32.totalorder %s808_s1, %s804_s26  ;;  %p162_p9 = scmp.eq.s32.totalorder %s507_s8, 2 }
  0x1d   : > { %1079 = sst [smem:[#allocation19_spill]] %s943_s18  ;;  %p167_p10 = scmp.ne.s32.totalorder %s804_s26, %s800_s0 }
  0x1e   : > { %p168_p11 = scmp.eq.s32.totalorder %s508_s9, 2  ;;  %p949_p12 = por %p162_p9, %p161_p8 }
  0x1f   : > { %p552_p0 = scmp.lt.s32.totalorder %s832_s7, 3  ;;  %s959_s22 = sand.u32 1, %s820_s29  }
  0x20   : > { %p953_p13 = por %p168_p11, %p167_p10  ;;  %s146_s21 = ssub.s32 %s144_s14, %s145_s16 }
  0x21   : > { %p149_p1 = scmp.eq.s32.totalorder %s146_s21, 0  ;;  %s511_s23 = sshll.u32 %s959_s22, 2 }
  0x22   : > { %s512_s24 = sshll.u32 %s828_s6, 2  ;;  %s1082_s2 = sld [smem:[#allocation20_spill]] }
  0x23   : > { %s964_s25 = scalar_select %p149_p1, %s808_s1, %s151_s17  }
  0x24   : > { %s192_s13 = scalar_lea.vmem [#allocation7], %s511_s23  ;;  %p973_p2 = pnand %p552_p0, %p929_p4 }
  0x25   : > { %s202_s10 = sshll.u32 %s192_s13, 4  ;;  %p516_p3 = scmp.ge.s32.totalorder %s832_s7, 1  ;;  %s203_s10 = int_to_ptr.vmem [resolvable:$true] %s202_s10 }
  0x26   : > { %p237_p5 = scmp.lt.s32.totalorder %s832_s7, 4  ;;  %s513_s16 = sshll.u32 %s959_s22, 3 }
  0x27   : > { %s189_s17 = scalar_lea.sflag [#allocation8], %s959_s22  ;;  %s531_s21 = sshll.u32 %s828_s6, 3 }
  0x28   : > { %s198_s9 = scalar_lea.hbm %s1082_s2, %s512_s24  ;;  %p238_p6 = pnand %p516_p3, %p237_p5 }
  0x29   : > { %s200_s11 = sshll.u32 %s198_s9, 4  ;;  %s213_s23 = scalar_lea.vmem [#allocation10], %s513_s16  ;;  %s201_s11 = int_to_ptr.hbm [resolvable:$true] %s200_s11 }
  0x2a   : > { %544 = dma.hbm_to_vmem [thread:$0]  (!%p973_p2), %s201_s11, 64, %s203_s10, %s189_s17  }
  0x2b   : > { %s223_s24 = sshll.u32 %s213_s23, 4  ;;  %s220_s12 = scalar_lea.hbm %s1070_s3, %s531_s21  ;;  %s224_s24 = int_to_ptr.vmem [resolvable:$true] %s223_s24 }
  0x2c   : > { %s221_s9 = sshll.u32 %s220_s12, 4  ;;  %s210_s13 = scalar_lea.sflag [#allocation11], %s959_s22  ;;  %s222_s9 = int_to_ptr.hbm [resolvable:$true] %s221_s9 }
  0x2d   : > { %s836_s2 = smov 64   ;;  %s837_s18 = smov 4  }
  0x2e   : > { %547 = dma.hbm_to_vmem [thread:$0]  (!%p973_p2), %s222_s9, 128, %s224_s24, %s210_s13, %s836_s2, %s836_s2, %s837_s18  }
  0x2f   : > { %241 = sbr.rel (%p238_p6) target bundleno = 350 (0x15e), region = 32  ;;  %s243_s10 = sand.u32 (!%p238_p6), 1, %s816_s28  }
  0x30   : > { %s517_s11 = sshll.u32 (!%p238_p6), %s243_s10, 2  ;;  %s244_s17 = scalar_lea.sflag (!%p238_p6), [#allocation8], %s243_s10 }
  0x31   : > { %s247_s16 = scalar_lea.vmem (!%p238_p6), [#allocation7], %s517_s11 }
  0x34   : > { %787 = dma.done.wait (%p936_p7), %s244_s17, 64  }
  0x35   : > { %789 = vsyncadd (%p936_p7), %s244_s17, 4294967232  ;;  %s518_s21 = sshll.u32 %s243_s10, 3  ;;  %s254_s23 = scalar_lea.sflag [#allocation11], %s243_s10 }
  0x36   : > { %s257_s22 = scalar_lea.vmem [#allocation10], %s518_s21 }
  0x37   : > { %791 = dma.done.wait (%p936_p7), %s254_s23, 128  }
  0x38   : > { %793 = vsyncadd (%p936_p7), %s254_s23, 4294967168  ;;  %s286_s2 = sand.u32 1, %s804_s26   ;;  %vm300_vm0 = vcmask 7168   ;;  %s1001_s18 = sld [smem:[#allocation6 + %s824_s30]]  ;;  %v838_v0 = vmov 0.0   ;;  %vm312_vm1 = vcmask 130048  }
  0x39   : > { %s1005_s14 = sshll.u32 %s286_s2, 3  ;;  %301 = vst.msk [vmem:[#allocation3] sm:$0xff] %vm300_vm0, %v838_v0  ;;  %v302_v1 = vld [vmem:[%s247_s16] sm:$0xf]  ;;  %v532_v2 = vld [vmem:[%s257_s22] sm:$0xff]  ;;  %p290_p4 = scmp.lt.s32.totalorder %s824_s30, 2 }
  0x3a   : > { %v332_v3 = vunpack.c.l.bf16 %v302_v1  ;;  %323 = vmatpush.bf16.msra.mxu0 %v532_v2  ;;  %v839_v5 = vmov 0   ;;  %s288_s12 = scalar_lea.vmem [#allocation12], %s1005_s14 }
  0x3b   : > { %s291_s15 = scalar_select %p290_p4, %s824_s30, 2  ;;  %632 = vset.pattern.permute.xlu0 %v839_v5 }
  0x3c   : > { %v333_v4 = vsel %vm312_vm1, %v332_v3, 0.0 }
  0x3d   : > { %334 = vadd.xlane.f32.xlu0 %v333_v4  ;;  %524 = vmatmul.msk.bf16.vlgmr.msra.gmra.mxu0 %vm312_vm1, %v302_v1  ;;  %s292_s8 = scalar_lea.vmem %s1071_s4, %s291_s15 }
  0x3e   : > { %v633_v14 = vld [vmem:[%s292_s8] ss:$0 sm:$0xff]  ;;  %p525_p7 = scmp.ne.s32.totalorder %s1001_s18, 1 }
  0x40   : > { %v331_v6 = vld [vmem:[#allocation3] sm:$0xff] }
  0xb0   : > { %v335_v7 = vpop.xlane.xlu0 %334 }
  0xb1   : > { %v336_v8 = vadd.f32 %v335_v7, %v331_v6 }
  0xb3   : > { %338 = vst.msk [vmem:[#allocation3] sm:$0xff] %vm300_vm0, %v336_v8 }
  0xba   : > { %v342_v9 = vld [vmem:[#allocation3] sm:$0xff]  ;;  %v325_v11 = vpop.f32.mrf.mxu0 }
  0xbb   : > { %v343_v10 = vmax.f32 %v342_v9, 1.0 }
  0xbd   : > { %634 = vrcp.f32 %v343_v10 }
  0xc2   : > { %v327_v13 = vpop.f32.mrf.mxu0 }
  0xc3   : > { %v635_v12 = vpop.eup %634 }
  0xc4   : > { %348 = vperm.xlu0 %632, %v635_v12  }
 0x135   : > { %361 = sbr.rel (%p525_p7) target bundleno = 316 (0x13c), region = 52 }
 0x136   : > { %v349_v15 = vpop.permute.xlu0 %348 }
 0x137   : > { %v351_v16 = vmul.f32 %v349_v15, %v325_v11 }
 0x139   : > { %v356_v17 = vadd.f32 %v633_v14, %v351_v16 }
 0x13b   : > { %362 = vst [vmem:[%s288_s12] sm:$0xff] %v356_v17 }
 0x13c PF: > { %p526_p8 = scmp.ne.s32.totalorder %s1001_s18, 0 }
 0x13e   : > { %366 = sbr.rel (%p526_p8) target bundleno = 327 (0x147), region = 56 }
 0x143   : > { %v367_v18 = vld [vmem:[%s288_s12] sm:$0xff] }
 0x144   : > { %v368_v19 = vadd.f32 %v367_v18, %v356_v17 }
 0x146   : > { %369 = vst [vmem:[%s288_s12] sm:$0xff] %v368_v19 }
 0x147 PF: > { %s537_s9 = scalar_select %p949_p12, [#allocation5], [#allocation13] }
 0x148   : > { %s1097_s30 = smov (!%p949_p12, %s824_s30), 0  ;;  %s385_s10 = sshll.u32 %s288_s12, 4  ;;  %s386_s10 = int_to_ptr.vmem [resolvable:$true] %s385_s10 }
 0x149   : > { %s378_s13 = sld [smem:[%s537_s9 + %s1097_s30]]  ;;  %s371_s22 = scalar_lea.sflag [#allocation9], %s286_s2 }
 0x14a   : > { %s740_s24 = scalar_lea.hbm %s1072_s5, 16 }
 0x14f   : > { %s528_s11 = sshll.u32 %s378_s13, 3 }
 0x150   : > { %s383_s21 = scalar_lea.hbm %s1072_s5, %s528_s11 }
 0x151   : > { %s387_s23 = sshll.u32 %s383_s21, 4  ;;  %s388_s23 = int_to_ptr.hbm [resolvable:$true] %s387_s23 }
 0x152   : > { %s734_s18 = sshra.s32 %s388_s23, 4  ;;  %s735_s18 = int_to_ptr.hbm [resolvable:$true] %s734_s18 }
 0x153   : > { %s736_s14 = scalar_lea.hbm %s735_s18, 8  ;;  %p741_p0 = scmp.lt.s32.totalorder %s735_s18, %s1072_s5 }
 0x154   : > { %p737_p9 = scmp.ne.s32.totalorder %s735_s18, %s736_s14  ;;  %p742_p1 = scmp.lt.s32.totalorder %s740_s24, %s736_s14 }
 0x156   : > { %p738_p10 = pnand %p737_p9, %p949_p12  ;;  %p743_p2 = por %p742_p1, %p741_p0 }
 0x158   : > { %p739_p11 = pneg %p738_p10 }
 0x15a   : > { %p744_p3 = pnand %p743_p2, %p739_p11 }
 0x15c   : > { %747 = shalt.err (!%p744_p3)
}
 0x15d   : > { %539 = dma.vmem_to_hbm [thread:$0]  (%p949_p12), %s386_s10, 128, %s388_s23, %s371_s22  }
 0x15e PF: > { %p553_p5 = scmp.ge.s32.totalorder %s832_s7, 2  ;;  %s399_s2 = sand.u32 1, %s800_s0  }
 0x15f   : > { %s400_s12 = scalar_lea.sflag [#allocation9], %s399_s2 }
 0x160   : > { %p549_p6 = pnand %p553_p5, %p953_p13 }
 0x162   : > { %p550_p4 = pneg %p549_p6 }
 0x164   : > { %795 = dma.done.wait (%p550_p4), %s400_s12, 128  }
 0x165   : > { %797 = vsyncadd (%p550_p4), %s400_s12, 4294967168  ;;  %s37_s7 = sadd.s32 1, %s832_s7   ;;  %s1084_s19 = sld [smem:[#allocation19_spill]] }
 0x166   : > { %p34_p7 = scmp.ge.s32.totalorder %s37_s7, 5   ;;  %s1085_s9 = sld [smem:[#allocation18_spill]] }
 0x167   : > { %s1086_s0 = smov %s804_s26  ;;  %s1087_s26 = smov %s808_s1 }
 0x168   : > { %s1088_s1 = smov %s964_s25  ;;  %s1089_s27 = smov %s816_s28 }
 0x169   : > { %s1090_s28 = smov %s820_s29  ;;  %s1092_s30 = smov %s828_s6 }
 0x16a   :  { %36 = sbr.rel (!%p34_p7) target bundleno = 18 (0x12), region = 109 }
 0x16b   : > { %s1091_s29 = smov %s1084_s19 }
 0x16c   : > { %s1093_s6 = smov %s1085_s9 }
 0x16f   :  { %406 = vsyncpa [#allocation8], 1 }
 0x170   :  { %408 = vsyncpa [#allocation8 + $0x1], 1 }
 0x171   :  { %409 = vsyncpa [#allocation11], 1 }
 0x172   :  { %411 = vsyncpa [#allocation11 + $0x1], 1 }
 0x173   :  { %412 = vsyncpa [#allocation9], 1 }
 0x174   :  { %414 = vsyncpa [#allocation9 + $0x1], 1 }

</bundles_post_ra>
